<compile_context>
chip_gen: v7x
topology: tpu7x:2x2x1
jax: 0.10.0
libtpu: 0.0.40
codegen_flags: <defaults>
</compile_context>

<pallas_src>
import jax
import jax.numpy as jnp
from jax.experimental import pallas as pl
from jax.experimental.pallas import tpu as pltpu


def _round_up(x, m):
    return (x + m - 1) // m * m


def _cdiv(a, b):
    return (a + b - 1) // b


# ---------------------------------------------------------------------------
# Kernel
# ---------------------------------------------------------------------------
def _mvit2_attn_kernel(x_ref, wkvi_ref, bkvi_ref, wo_ref, bo_ref, o_ref):
    Bb, N, D = x_ref.shape
    Dp = wo_ref.shape[0]                       # lane-padded feature dim (>= D)

    x2 = x_ref[...].reshape(Bb * N, D)

    # One fused MXU matmul against [Wk | Wv | Wi,0...] : (Bb*N, 2*Dp + 128),
    # accumulated in f32.  Padding columns have zero weights AND zero bias.
    kvi = jnp.dot(x2, wkvi_ref[...],
                  preferred_element_type=jnp.float32) + bkvi_ref[...]

    k = kvi[:, :Dp].reshape(Bb, N, Dp)
    v_proj = kvi[:, Dp:2 * Dp].reshape(Bb, N, Dp)

    # fc_i's logit lives in column 2*Dp; the remaining 127 columns of that
    # block are exactly zero, so a lane reduce recovers it bit-exactly.
    logits = jnp.sum(kvi[:, 2 * Dp:], axis=-1, keepdims=True).reshape(Bb, N, 1)

    # Softmax over the sequence dim (fc_i's scalar bias dropped: softmax is
    # invariant to a constant shift of the logits).
    m = jnp.max(logits, axis=1, keepdims=True)                     # (Bb, 1, 1)
    e = jnp.exp(logits - m)                                        # (Bb, N, 1)
    w = e * pl.reciprocal(jnp.sum(e, axis=1, keepdims=True), approx=True)

    cv = jnp.sum(w * k, axis=1, keepdims=True)                     # (Bb, 1, Dp)

    # fc_o: fold v = v_proj * cv straight into the matmul operand.
    v = (v_proj * cv).reshape(Bb * N, Dp).astype(wo_ref.dtype)
    out = jnp.dot(v, wo_ref[...],
                  preferred_element_type=jnp.float32) + bo_ref[...]
    o_ref[...] = out.reshape(Bb, N, D).astype(o_ref.dtype)


# ---------------------------------------------------------------------------
# Parameter packing (run once at parameter-load time, reuse every forward)
# ---------------------------------------------------------------------------
def prepare_mobilevitv2_params(wi, wk, bk, wv, bv, wo, bo, *, dtype):
    """Pack torch-layout Linear weights into the fused/padded kernel operands.

    wi: (1, D); wk/wv/wo: (D, D) in torch (out, in) layout; bk/bv/bo: (D,).
    fc_i's bias is not needed (softmax over the sequence dim is shift-invariant).
    """
    D = wk.shape[0]
    Dp = _round_up(D, 128)
    pad = Dp - D

    def col_pad(w):                            # (out, in) -> (D, Dp), zero cols
        return jnp.pad(w.T, ((0, 0), (0, pad)))

    wi_blk = jnp.pad(wi.T, ((0, 0), (0, 127)))                # (D, 128), Wi col 0
    wkvi = jnp.concatenate([col_pad(wk), col_pad(wv), wi_blk],
                           axis=1).astype(dtype)              # (D, 2*Dp + 128)
    bkvi = jnp.concatenate(
        [jnp.pad(bk, (0, pad)), jnp.pad(bv, (0, pad)),
         jnp.zeros((128,), bk.dtype)]).reshape(1, -1).astype(jnp.float32)
    wo_p = jnp.pad(wo.T, ((0, pad), (0, 0))).astype(dtype)    # (Dp, D)
    bo_p = bo.reshape(1, D).astype(jnp.float32)
    return wkvi, bkvi, wo_p, bo_p


# ---------------------------------------------------------------------------
# VMEM-aware sizing
# ---------------------------------------------------------------------------
def _default_vmem_limit_bytes():
    # ~70% of this chip's per-core VMEM: leaves double-buffer + compiler-scratch
    # headroom on v7x (64 MiB/TC) while letting v5e/v6e (128 MiB) use big blocks.
    try:
        return int(pltpu.get_tpu_info().vmem_capacity_bytes * 0.7)
    except Exception:
        return 48 * 1024 * 1024            # conservative: safe on every generation


def _auto_block_batch(B, N, D, Dp, itemsize, vmem_limit_bytes):
    kvi_cols = 2 * Dp + 128
    # True per-batch-element footprint of one grid step:
    per_b = N * (
        4 * D * itemsize                   # x and out tiles, double-buffered
        + kvi_cols * 4                     # f32 kvi intermediate
        + Dp * 4 + Dp * itemsize           # f32 (v_proj*cv) + its dtype-cast copy
        + D * 4                            # f32 fc_o result before the final cast
        + 64                               # logits / softmax scratch
    )
    # Resident weights + biases (double-buffered by the default pipeliner).
    fixed = 2 * ((D * kvi_cols + Dp * D) * itemsize + (kvi_cols + D) * 4)
    budget = int(0.7 * vmem_limit_bytes) - fixed
    bb = budget // per_b if budget >= per_b else 1
    bb = max(1, min(bb, B))
    # Keep >= 2 grid steps so the "parallel" batch axis spans both TensorCores
    # on dual-core chips (v7x); the extra grid-step cost elsewhere is ~0.35 us.
    if B > 1:
        bb = min(bb, _cdiv(B, 2))
    return max(1, bb)


# ---------------------------------------------------------------------------
# Entry points
# ---------------------------------------------------------------------------
def mobilevitv2_attention_prepared(x, wkvi, bkvi, wo_p, bo_p, *,
                                   block_batch=None, vmem_limit_bytes=None):
    """Forward with pre-packed parameters (see prepare_mobilevitv2_params)."""
    B, N, D = x.shape
    dt = x.dtype
    it = jnp.dtype(dt).itemsize
    Dp = wo_p.shape[0]
    kvi_cols = wkvi.shape[1]

    if vmem_limit_bytes is None:
        vmem_limit_bytes = _default_vmem_limit_bytes()
    if block_batch is None:
        block_batch = _auto_block_batch(B, N, D, Dp, it, vmem_limit_bytes)
    Bb = int(max(1, min(block_batch, B)))
    grid = (_cdiv(B, Bb),)                 # ragged last block handled by Pallas

    # TODO(synk): for very large N*Dp (notably v7x's 64 MiB VMEM) tile the
    # sequence dim with an online-softmax + running-cv accumulation instead of
    # taking the full (Bb, N, D) slab per grid step.

    const = lambda b: (0, 0)
    cost = pl.CostEstimate(
        flops=int(2 * B * N * D * kvi_cols + 2 * B * N * Dp * D),
        transcendentals=int(B * N),
        bytes_accessed=int(2 * B * N * D * it
                           + (D * kvi_cols + Dp * D) * it
                           + (kvi_cols + D) * 4),
    )

    grid_spec = pltpu.PrefetchScalarGridSpec(
        num_scalar_prefetch=0,
        grid=grid,
        in_specs=[
            pl.BlockSpec((Bb, N, D), lambda b: (b, 0, 0)),        # x
            pl.BlockSpec((D, kvi_cols), const),                   # [Wk | Wv | Wi]
            pl.BlockSpec((1, kvi_cols), const),                   # [bk | bv | 0]
            pl.BlockSpec((Dp, D), const),                         # Wo
            pl.BlockSpec((1, D), const),                          # bo
        ],
        out_specs=pl.BlockSpec((Bb, N, D), lambda b: (b, 0, 0)),
    )
    return pl.pallas_call(
        _mvit2_attn_kernel,
        out_shape=jax.ShapeDtypeStruct((B, N, D), dt),
        grid_spec=grid_spec,
        compiler_params=pltpu.CompilerParams(
            dimension_semantics=("parallel",),
            vmem_limit_bytes=int(vmem_limit_bytes)),
        cost_estimate=cost,
    )(x, wkvi, bkvi, wo_p, bo_p)


def mobilevitv2_attention(x, wi, bi, wk, bk, wv, bv, wo, bo, *,
                          block_batch=None, vmem_limit_bytes=None):
    """Convenience wrapper matching the torch module's parameter list.

    For inference loops, call prepare_mobilevitv2_params() once and
    mobilevitv2_attention_prepared() per step to hoist the weight packing.
    `bi` is unused: softmax over the sequence dim is invariant to it.
    """
    del bi
    params = prepare_mobilevitv2_params(wi, wk, bk, wv, bv, wo, bo, dtype=x.dtype)
    return mobilevitv2_attention_prepared(
        x, *params, block_batch=block_batch, vmem_limit_bytes=vmem_limit_bytes)


# ---------------------------------------------------------------------------
# Reference + self-test
# ---------------------------------------------------------------------------
def _reference(x, wi, bi, wk, bk, wv, bv, wo, bo):
    """Pure-JAX reference mirroring the PyTorch forward."""
    i = x @ wi.T + bi                                      # (B, N, 1)
    w = jax.nn.softmax(i, axis=1)
    k = x @ wk.T + bk
    cv = jnp.sum(w * k, axis=1, keepdims=True)             # (B, 1, D)
    v = (x @ wv.T + bv) * cv
    return v @ wo.T + bo


if __name__ == "__main__":
    B, N, D = 2, 8, 32                                     # (b_s, nq, d_model)
    key = jax.random.PRNGKey(0)
    kx, ki, kk, kvk, ko, kb = jax.random.split(key, 6)
    kb1, kb2, kb3 = jax.random.split(kb, 3)

    x = jax.random.normal(kx, (B, N, D), dtype=jnp.float32)

    # nn.Linear weights ~ N(0, 0.001); small nonzero biases to exercise bias paths.
    wi = 0.001 * jax.random.normal(ki, (1, D), dtype=jnp.float32)
    bi = jnp.zeros((1,), dtype=jnp.float32)
    wk = 0.001 * jax.random.normal(kk, (D, D), dtype=jnp.float32)
    bk = 0.01 * jax.random.normal(kb1, (D,), dtype=jnp.float32)
    wv = 0.001 * jax.random.normal(kvk, (D, D), dtype=jnp.float32)
    bv = 0.01 * jax.random.normal(kb2, (D,), dtype=jnp.float32)
    wo = 0.001 * jax.random.normal(ko, (D, D), dtype=jnp.float32)
    bo = 0.01 * jax.random.normal(kb3, (D,), dtype=jnp.float32)

    out = mobilevitv2_attention(x, wi, bi, wk, bk, wv, bv, wo, bo)
    out = jax.block_until_ready(out)

    ref = _reference(x, wi, bi, wk, bk, wv, bv, wo, bo)
    assert out.shape == (B, N, D)
    max_err = jnp.max(jnp.abs(out - ref))
    assert jnp.allclose(out, ref, atol=2e-5, rtol=2e-3), (
        f"mismatch vs reference: max abs err {max_err}")

    print("KERNEL_OK")
</pallas_src>

<mosaic_0001>
module attributes {stable_mosaic.version = 11 : i64} {
  func.func @_mvit2_attn_kernel(%arg0: i32, %arg1: memref<1x8x32xf32, #tpu.memory_space<vmem>>, %arg2: memref<32x384xf32, #tpu.memory_space<vmem>>, %arg3: memref<1x384xf32, #tpu.memory_space<vmem>>, %arg4: memref<128x32xf32, #tpu.memory_space<vmem>>, %arg5: memref<1x32xf32, #tpu.memory_space<vmem>>, %arg6: memref<1x8x32xf32, #tpu.memory_space<vmem>>) attributes {dimension_semantics = [#tpu.dimension_semantics<parallel>], iteration_bounds = array<i64: 2>, scalar_prefetch = 0 : i64, scratch_operands = 0 : i64, tpu.core_type = #tpu.core_type<tc>, window_params = [{transform_indices = @transform_0, window_bounds = array<i64: 1, 8, 32>}, {pipeline_mode = #tpu.pipeline_mode<synchronous>, transform_indices = @transform_1, window_bounds = array<i64: 32, 384>}, {pipeline_mode = #tpu.pipeline_mode<synchronous>, transform_indices = @transform_2, window_bounds = array<i64: 1, 384>}, {pipeline_mode = #tpu.pipeline_mode<synchronous>, transform_indices = @transform_3, window_bounds = array<i64: 128, 32>}, {pipeline_mode = #tpu.pipeline_mode<synchronous>, transform_indices = @transform_4, window_bounds = array<i64: 1, 32>}, {transform_indices = @transform_5, window_bounds = array<i64: 1, 8, 32>}]} {
    %c0 = arith.constant 0 : index
    %c0_0 = arith.constant 0 : index
    %c0_1 = arith.constant 0 : index
    %0 = vector.load %arg1[%c0, %c0_0, %c0_1] : memref<1x8x32xf32, #tpu.memory_space<vmem>>, vector<1x8x32xf32>
    %1 = vector.shape_cast %0 : vector<1x8x32xf32> to vector<8x32xf32>
    %c0_2 = arith.constant 0 : index
    %c0_3 = arith.constant 0 : index
    %2 = vector.load %arg2[%c0_2, %c0_3] : memref<32x384xf32, #tpu.memory_space<vmem>>, vector<32x384xf32>
    %cst = arith.constant dense<0.000000e+00> : vector<8x384xf32>
    %3 = tpu.matmul %1, %2, %cst {dimension_numbers = #tpu.dot_dimension_numbers<[1], [0], [0], [1], [0, 0, 1, 1], [], []>} : vector<8x32xf32>, vector<32x384xf32>, vector<8x384xf32> -> vector<8x384xf32>
    %c0_4 = arith.constant 0 : index
    %c0_5 = arith.constant 0 : index
    %4 = vector.load %arg3[%c0_4, %c0_5] : memref<1x384xf32, #tpu.memory_space<vmem>>, vector<1x384xf32>
    %5 = vector.broadcast %4 : vector<1x384xf32> to vector<8x384xf32>
    %6 = arith.addf %3, %5 : vector<8x384xf32>
    %7 = vector.extract_strided_slice %6 {offsets = [0, 0], sizes = [8, 128], strides = [1, 1]} : vector<8x384xf32> to vector<8x128xf32>
    %8 = vector.shape_cast %7 : vector<8x128xf32> to vector<1x8x128xf32>
    %9 = vector.extract_strided_slice %6 {offsets = [0, 128], sizes = [8, 128], strides = [1, 1]} : vector<8x384xf32> to vector<8x128xf32>
    %10 = vector.shape_cast %9 : vector<8x128xf32> to vector<1x8x128xf32>
    %11 = vector.extract_strided_slice %6 {offsets = [0, 256], sizes = [8, 128], strides = [1, 1]} : vector<8x384xf32> to vector<8x128xf32>
    %cst_6 = arith.constant dense<0.000000e+00> : vector<8xf32>
    %12 = vector.multi_reduction <add>, %11, %cst_6 [1] : vector<8x128xf32> to vector<8xf32>
    %13 = vector.shape_cast %12 : vector<8xf32> to vector<8x1xf32>
    %14 = vector.shape_cast %13 : vector<8x1xf32> to vector<1x8x1xf32>
    %cst_7 = arith.constant dense<0xFF800000> : vector<1x1xf32>
    %15 = vector.multi_reduction <maximumf>, %14, %cst_7 [1] : vector<1x8x1xf32> to vector<1x1xf32>
    %16 = vector.shape_cast %15 : vector<1x1xf32> to vector<1x1x1xf32>
    %17 = vector.broadcast %16 : vector<1x1x1xf32> to vector<1x8x1xf32>
    %18 = arith.subf %14, %17 : vector<1x8x1xf32>
    %19 = math.exp %18 : vector<1x8x1xf32>
    %cst_8 = arith.constant dense<0.000000e+00> : vector<1x1xf32>
    %20 = vector.multi_reduction <add>, %19, %cst_8 [1] : vector<1x8x1xf32> to vector<1x1xf32>
    %21 = vector.shape_cast %20 : vector<1x1xf32> to vector<1x1x1xf32>
    %22 = tpu.reciprocal %21 {approx = true} : vector<1x1x1xf32> -> vector<1x1x1xf32>
    %23 = vector.broadcast %22 : vector<1x1x1xf32> to vector<1x8x1xf32>
    %24 = arith.mulf %19, %23 : vector<1x8x1xf32>
    %25 = vector.broadcast %24 : vector<1x8x1xf32> to vector<1x8x128xf32>
    %26 = arith.mulf %25, %8 : vector<1x8x128xf32>
    %cst_9 = arith.constant dense<0.000000e+00> : vector<1x128xf32>
    %27 = vector.multi_reduction <add>, %26, %cst_9 [1] : vector<1x8x128xf32> to vector<1x128xf32>
    %28 = vector.shape_cast %27 : vector<1x128xf32> to vector<1x1x128xf32>
    %29 = vector.broadcast %28 : vector<1x1x128xf32> to vector<1x8x128xf32>
    %30 = arith.mulf %10, %29 : vector<1x8x128xf32>
    %31 = vector.shape_cast %30 : vector<1x8x128xf32> to vector<8x128xf32>
    %c0_10 = arith.constant 0 : index
    %c0_11 = arith.constant 0 : index
    %32 = vector.load %arg4[%c0_10, %c0_11] : memref<128x32xf32, #tpu.memory_space<vmem>>, vector<128x32xf32>
    %cst_12 = arith.constant dense<0.000000e+00> : vector<8x32xf32>
    %33 = tpu.matmul %31, %32, %cst_12 {dimension_numbers = #tpu.dot_dimension_numbers<[1], [0], [0], [1], [0, 0, 1, 1], [], []>} : vector<8x128xf32>, vector<128x32xf32>, vector<8x32xf32> -> vector<8x32xf32>
    %c0_13 = arith.constant 0 : index
    %c0_14 = arith.constant 0 : index
    %34 = vector.load %arg5[%c0_13, %c0_14] : memref<1x32xf32, #tpu.memory_space<vmem>>, vector<1x32xf32>
    %35 = vector.broadcast %34 : vector<1x32xf32> to vector<8x32xf32>
    %36 = arith.addf %33, %35 : vector<8x32xf32>
    %37 = vector.shape_cast %36 : vector<8x32xf32> to vector<1x8x32xf32>
    %c0_15 = arith.constant 0 : index
    %c0_16 = arith.constant 0 : index
    %c0_17 = arith.constant 0 : index
    %38 = vector.load %arg6[%c0_15, %c0_16, %c0_17] : memref<1x8x32xf32, #tpu.memory_space<vmem>>, vector<1x8x32xf32>
    tpu.vector_store %arg6[%c0_15, %c0_16, %c0_17], %37 {strides = array<i32>} : memref<1x8x32xf32, #tpu.memory_space<vmem>>, vector<1x8x32xf32>,
    return
  }
  func.func @transform_0(%arg0: i32) -> (i32, i32, i32) {
    %c0_i32 = arith.constant 0 : i32
    %c0_i32_0 = arith.constant 0 : i32
    %c0_i32_1 = arith.constant 0 : i32
    return %arg0, %c0_i32, %c0_i32_0 : i32, i32, i32
  }
  func.func @transform_1(%arg0: i32) -> (i32, i32) {
    %c0_i32 = arith.constant 0 : i32
    %c0_i32_0 = arith.constant 0 : i32
    %c0_i32_1 = arith.constant 0 : i32
    return %c0_i32, %c0_i32_0 : i32, i32
  }
  func.func @transform_2(%arg0: i32) -> (i32, i32) {
    %c0_i32 = arith.constant 0 : i32
    %c0_i32_0 = arith.constant 0 : i32
    %c0_i32_1 = arith.constant 0 : i32
    return %c0_i32, %c0_i32_0 : i32, i32
  }
  func.func @transform_3(%arg0: i32) -> (i32, i32) {
    %c0_i32 = arith.constant 0 : i32
    %c0_i32_0 = arith.constant 0 : i32
    %c0_i32_1 = arith.constant 0 : i32
    return %c0_i32, %c0_i32_0 : i32, i32
  }
  func.func @transform_4(%arg0: i32) -> (i32, i32) {
    %c0_i32 = arith.constant 0 : i32
    %c0_i32_0 = arith.constant 0 : i32
    %c0_i32_1 = arith.constant 0 : i32
    return %c0_i32, %c0_i32_0 : i32, i32
  }
  func.func @transform_5(%arg0: i32) -> (i32, i32, i32) {
    %c0_i32 = arith.constant 0 : i32
    %c0_i32_0 = arith.constant 0 : i32
    %c0_i32_1 = arith.constant 0 : i32
    return %arg0, %c0_i32, %c0_i32_0 : i32, i32, i32
  }
}

</mosaic_0001>

<bundles_post_ra>
// kernel: tpu_custom_call.1
= control target key start
LH: loop header
LB: loop body
LE: loop exit
PB: predicated region body
PF: predicated region fallthrough
CT: control target
= control target key end

     0   :  { %10 = vsyncpa [#allocation3], 0  ;;  %s1073_s0 = inlined_call_operand.vmem [shape: f32[2,8,32], index: 0, kind: input, shape index: {}]   ;;  %s1074_s1 = inlined_call_operand.vmem [shape: f32[32,384], index: 1, kind: input, shape index: {}]   ;;  %s1075_s2 = inlined_call_operand.vmem [shape: f32[1,384], index: 2, kind: input, shape index: {}]   ;;  %s1076_s3 = inlined_call_operand.vmem [shape: f32[128,32], index: 3, kind: input, shape index: {}]   ;;  %s1077_s4 = inlined_call_operand.vmem [shape: f32[1,32], index: 4, kind: input, shape index: {}]   ;;  %s1078_s5 = inlined_call_operand.hbm [shape: f32[2,8,32], index: 5, kind: output, shape index: {}]  }
   0x1   :  { %12 = vsyncpa [#allocation3 + $0x1], 0  ;;  %s852_s18 = smov 0   ;;  %s854_s19 = smov 0  }
   0x2   :  { %s856_s20 = smov 0   ;;  %s858_s21 = smov 0  }
   0x3 LB: > { %s873_s22 = sadd.s32 4294967295, %s816_s21   ;;  %s589_s23 = sadd.s32 4294967294, %s816_s21   ;;  %s816_s21 = sphi %s858_s21, %s1084_s21   ;;  %s812_s20 = sphi %s856_s20, %s1083_s20   ;;  %s808_s19 = sphi %s854_s19, %s1082_s19   ;;  %s804_s18 = sphi %s852_s18, %s1081_s18  }
   0x4   : > { %s877_s24 = sadd.s32 1, %s816_s21   ;;  %s135_s25 = sadd.s32 1, %s812_s20 }
   0x5   : > { %s132_s26 = ssub.s32 %s816_s21, %s877_s24  ;;  %p145_p0 = scmp.ne.s32.totalorder %s812_s20, %s808_s19 }
   0x6   : > { %p133_p1 = scmp.eq.s32.totalorder %s132_s26, 0  ;;  %p146_p2 = scmp.eq.s32.totalorder %s873_s22, 1 }
   0x7   : > { %p151_p3 = scmp.ne.s32.totalorder %s808_s19, %s804_s18  ;;  %p152_p4 = scmp.eq.s32.totalorder %s589_s23, 1 }
   0x8   : > { %s888_s27 = scalar_select %p133_p1, %s812_s20, %s135_s25  }
   0x9   : > { %p890_p5 = por %p146_p2, %p145_p0  ;;  %p894_p6 = por %p152_p4, %p151_p3 }
   0xa   : > { %p592_p7 = scmp.ge.s32.totalorder %s816_s21, 1  ;;  %p189_p8 = scmp.lt.s32.totalorder %s816_s21, 3 }
   0xc   : > { %p190_p9 = pnand %p592_p7, %p189_p8 }
   0xd   : > { %v222_v0 = vld [vmem:[%s1074_s1 + $0x8] sm:$0xff] (!%p190_p9)  ;;  %v225_v1 = vld [vmem:[%s1074_s1 + $0x20] sm:$0xff] (!%p190_p9)  ;;  %p216_p10 = scmp.lt.s32.totalorder (!%p190_p9), %s873_s22, 1  ;;  %v224_v4 = vld [vmem:[%s1074_s1 + $0x18] sm:$0xff] (!%p190_p9)  ;;  %v818_v7 = vmov (!%p190_p9), 0.0   ;;  %v819_v12 = vmov (!%p190_p9), 0.0|0.0   ;;  %v235_v21 = vlaneseq (!%p190_p9) }
   0xe   : > { %193 = sbr.rel (%p190_p9) target bundleno = 686 (0x2ae), region = 40  ;;  %v221_v2 = vld [vmem:[%s1074_s1] sm:$0xff] (!%p190_p9)  ;;  %v670_v3 = vpack.c.bf16 (!%p190_p9), %v225_v1, %v222_v0  ;;  %v228_v5 = vld [vmem:[%s1074_s1 + $0x38] sm:$0xff] (!%p190_p9)  ;;  %v231_v6 = vld [vmem:[%s1074_s1 + $0x50] sm:$0xff] (!%p190_p9)  ;;  %318 = vmatprep.mubr.f32.mxu1 (!%p190_p9), %v818_v7  ;;  %684 = vmatprep.subr.bf16.mxu0 (!%p190_p9), %v819_v12  ;;  %vm820_vm0 = vmmov (!%p190_p9), 0   ;;  %vm250_vm1 = vcmask (!%p190_p9), 261120  }
   0xf   : > { %v672_v8 = vpack.c.bf16 (!%p190_p9), %v224_v4, %v221_v2  ;;  %v674_v9 = vpack.c.bf16 (!%p190_p9), %v231_v6, %v228_v5  ;;  %v227_v10 = vld [vmem:[%s1074_s1 + $0x30] sm:$0xff] (!%p190_p9)  ;;  %v230_v11 = vld [vmem:[%s1074_s1 + $0x48] sm:$0xff] (!%p190_p9)  ;;  %667 = vmatprep.mubr.msk.f32.mxu0 (!%p190_p9), %vm820_vm0, %v818_v7  ;;  %v229_v18 = vld [vmem:[%s1074_s1 + $0x40] sm:$0xff] (!%p190_p9)  ;;  %v948_v22 = vshrl.u32 (!%p190_p9), %v235_v21, 7  ;;  %s213_s26 = sand.u32 (!%p190_p9), 1, %s808_s19   ;;  %s599_s8 = sshll.u32 (!%p190_p9), %s873_s22, 7 }
  0x10   : > { %671 = vmatprep.subr.bf16.mxu1 (!%p190_p9), %v670_v3  ;;  %v676_v13 = vpack.c.bf16 (!%p190_p9), %v230_v11, %v227_v10  ;;  %v223_v14 = vld [vmem:[%s1074_s1 + $0x10] sm:$0xff] (!%p190_p9)  ;;  %v226_v15 = vld [vmem:[%s1074_s1 + $0x28] sm:$0xff] (!%p190_p9)  ;;  %v232_v19 = vld [vmem:[%s1074_s1 + $0x58] sm:$0xff] (!%p190_p9)  ;;  %s1030_s13 = scalar_lea.hbm (!%p190_p9), %s1078_s5, %s599_s8  ;;  %s517_s14 = scalar_lea.sflag (!%p190_p9), [#allocation3], %s213_s26 }
  0x11   : > { %673 = vmatpush1.bf16.msra.mxu1 (!%p190_p9), %v672_v8  ;;  %v679_v17 = vpack.c.bf16 (!%p190_p9), %v226_v15, %v223_v14  ;;  %v682_v20 = vpack.c.bf16 (!%p190_p9), %v232_v19, %v229_v18  ;;  %v245_v25 = vsub.s32 (!%p190_p9), 2, %v948_v22  ;;  %v958_v26 = vld [vmem:[%s1075_s2] sm:$0x7] (!%p190_p9)  ;;  %v423_v32 = vld [vmem:[%s1076_s3 + $0x8] sm:$0xff] (!%p190_p9)  ;;  %v424_v33 = vld [vmem:[%s1076_s3 + $0x10] sm:$0xff] (!%p190_p9)  ;;  %v241_v14 = vsub.s32 (!%p190_p9), 1, %v948_v22 }
  0x12   : > { %675 = vmatprep.subr.bf16.mxu1 (!%p190_p9), %v674_v9  ;;  %v422_v31 = vld [vmem:[%s1076_s3] sm:$0xff] (!%p190_p9)  ;;  %v425_v35 = vld [vmem:[%s1076_s3 + $0x18] sm:$0xff] (!%p190_p9)  ;;  %v427_v38 = vld [vmem:[%s1076_s3 + $0x28] sm:$0xff] (!%p190_p9) }
  0x13   : > { %v246_v27 = vrot.slane (!%p190_p9), %v958_v26, %v245_v25  ;;  %v685_v34 = vpack.c.bf16 (!%p190_p9), %v423_v32, %v422_v31  ;;  %v688_v36 = vpack.c.bf16 (!%p190_p9), %v425_v35, %v424_v33  ;;  %v426_v37 = vld [vmem:[%s1076_s3 + $0x20] sm:$0xff] (!%p190_p9)  ;;  %v428_v40 = vld [vmem:[%s1076_s3 + $0x30] sm:$0xff] (!%p190_p9)  ;;  %v429_v41 = vld [vmem:[%s1076_s3 + $0x38] sm:$0xff] (!%p190_p9) }
  0x14   : > { %v691_v39 = vpack.c.bf16 (!%p190_p9), %v427_v38, %v426_v37  ;;  %v694_v42 = vpack.c.bf16 (!%p190_p9), %v429_v41, %v428_v40  ;;  %v430_v43 = vld [vmem:[%s1076_s3 + $0x40] sm:$0xff] (!%p190_p9)  ;;  %v431_v44 = vld [vmem:[%s1076_s3 + $0x48] sm:$0xff] (!%p190_p9)  ;;  %v432_v46 = vld [vmem:[%s1076_s3 + $0x50] sm:$0xff] (!%p190_p9) }
  0x15   : > { %s217_s30 = scalar_select %p216_p10, %s873_s22, 1  ;;  %677 = vmatpush1.bf16.msra.mxu1 %v676_v13  ;;  %686 = vmatpush3.bf16.msra.mxu0 %v685_v34  ;;  %v697_v45 = vpack.c.bf16 %v431_v44, %v430_v43  ;;  %v433_v47 = vld [vmem:[%s1076_s3 + $0x58] sm:$0xff]  ;;  %v434_v49 = vld [vmem:[%s1076_s3 + $0x60] sm:$0xff]  ;;  %v435_v50 = vld [vmem:[%s1076_s3 + $0x68] sm:$0xff] }
  0x16   : > { %678 = vmatprep.subr.bf16.mxu1 %v819_v12  ;;  %687 = vmatprep.subr.bf16.mxu0 %v819_v12  ;;  %v700_v48 = vpack.c.bf16 %v433_v47, %v432_v46  ;;  %v703_v51 = vpack.c.bf16 %v435_v50, %v434_v49  ;;  %v436_v52 = vld [vmem:[%s1076_s3 + $0x70] sm:$0xff]  ;;  %v437_v53 = vld [vmem:[%s1076_s3 + $0x78] sm:$0xff]  ;;  %s821_s22 = smov [#allocation2]  }
  0x17   : > { %s594_s6 = sshll.u32 %s217_s30, 3  ;;  %v706_v54 = vpack.c.bf16 %v437_v53, %v436_v52  ;;  %s593_s30 = sshll.u32 %s213_s26, 3 }
  0x18   : > { %s219_s9 = scalar_lea.vmem %s1073_s0, %s594_s6  ;;  %s758_s16 = sshll.u32 %s821_s22, 4  ;;  %s759_s16 = int_to_ptr.vmem [resolvable:$false] %s758_s16 }
  0x19   : > { %v220_v16 = vld [vmem:[%s219_s9] sm:$0xff]  ;;  %689 = vmatpush3.bf16.msra.mxu0 %v688_v36  ;;  %s215_s9 = scalar_lea.vmem [#allocation2], %s593_s30  ;;  %s760_s17 = scalar_lea.vmem %s759_s16, 256 }
  0x1a   : > { %595 = vmatmul.mubr.msk.f32.vlgmr.msra.gmra.mrb[0].mxu1 %vm250_vm1, %v220_v16  ;;  %690 = vmatprep.subr.bf16.mxu0 %v819_v12  ;;  %s530_s10 = sshll.u32 %s215_s9, 4  ;;  %s1032_s10 = int_to_ptr.vmem [resolvable:$true] %s530_s10 }
  0x1b   : > { %680 = vmatpush3.bf16.msra.mxu1 %v679_v17  ;;  %632 = vmatprep.mubr.msk.f32.mxu1 %vm820_vm0, %v818_v7  ;;  %v237_v7 = vsub.s32 0, %v948_v22  ;;  %v242_v17 = vrot.slane %v958_v26, %v241_v14  ;;  %s754_s15 = scalar_lea.vmem %s1032_s10, 128  ;;  %p761_p0 = scmp.lt.s32.totalorder %s1032_s10, %s759_s16 }
  0x1c   : > { %681 = vmatprep.subr.bf16.mxu1 %v819_v12  ;;  %p755_p11 = scmp.ne.s32.totalorder %s1032_s10, %s754_s15  ;;  %p762_p1 = scmp.lt.s32.totalorder %s760_s17, %s754_s15 }
  0x1d   : > { %692 = vmatpush3.bf16.msra.mxu0 %v691_v39  ;;  %v238_v8 = vrot.slane %v958_v26, %v237_v7 }
  0x1e   : > { %693 = vmatprep.subr.bf16.mxu0 %v819_v12  ;;  %p756_p12 = pnand %p755_p11, %p890_p5  ;;  %p763_p2 = por %p762_p1, %p761_p0 }
  0x1f   : > { %683 = vmatpush3.bf16.msra.mxu1 %v682_v20 }
  0x20   : > { %p757_p13 = pneg %p756_p12 }
  0x21   : > { %695 = vmatpush3.bf16.msra.mxu0 %v694_v42 }
  0x22   : > { %633 = vmatmul.mubr.msk.f32.vlgmr.msra.gmra.mrb[2].mxu1 %vm250_vm1, %v220_v16  ;;  %696 = vmatprep.subr.bf16.mxu0 %v819_v12  ;;  %p764_p3 = pnand %p763_p2, %p757_p13 }
  0x25   : > { %698 = vmatpush3.bf16.msra.mxu0 %v697_v45 }
  0x26   : > { %699 = vmatprep.subr.bf16.mxu0 %v819_v12 }
  0x29   : > { %701 = vmatpush3.bf16.msra.mxu0 %v700_v48 }
  0x2a   : > { %702 = vmatprep.subr.bf16.mxu0 %v819_v12 }
  0x2d   : > { %704 = vmatpush3.bf16.msra.mxu0 %v703_v51 }
  0x2e   : > { %705 = vmatprep.subr.bf16.mxu0 %v819_v12 }
  0x31   : > { %707 = vmatpush3.bf16.msra.mxu0 %v706_v54 }
  0xed   : > { %v950_v23 = vpop.f32.mrb[0].mxu1 }
  0xee   : > { %v952_v24 = vpop.f32.mrb[1].mxu1  ;;  %v321_v10 = vadd.f32 %v950_v23, %v238_v8  ;;  %v597_v23 = vld [vmem:[%s1077_s4] ss:$0 sm:$0xff] }
  0xef   : > { %v323_v20 = vadd.f32 %v952_v24, %v242_v17 }
  0xf5   : > { %v391_v28 = vpop.f32.mrb[2].mxu1 }
  0xf6   : > { %v634_v29 = vpop.f32.mrb[3].mxu1  ;;  %v392_v30 = vadd.f32 %v391_v28, %v246_v27 }
  0xf8   : > { %395 = vadd.xlane.f32.xlu0 %v392_v30 }
 0x185   : > { %v396_v55 = vpop.xlane.xlu0 %395 }
 0x186   : > { %v397_v56 = vrot.slane %v396_v55, 4 }
 0x188   : > { %v398_v57 = vmax.f32 %v396_v55, %v397_v56 }
 0x18a   : > { %v399_v58 = vrot.slane %v398_v57, 2 }
 0x18c   : > { %v400_v59 = vmax.f32 %v398_v57, %v399_v58 }
 0x18e   : > { %v401_v60 = vrot.slane %v400_v59, 1 }
 0x190   : > { %v402_v61 = vmax.f32 %v400_v59, %v401_v60 }
 0x192   : > { %v403_v62 = vsub.f32 %v396_v55, %v402_v61 }
 0x194   : > { %v404_v63 = vmul.f32 1.442695, %v403_v62 }
 0x196   : > { %750 = vpow2.f32 %v404_v63 }
 0x1a0   : > { %v751_v0 = vpop.eup %750 }
 0x1a1   : > { %v406_v1 = vrot.slane %v751_v0, 4 }
 0x1a3   : > { %v407_v2 = vadd.f32 %v751_v0, %v406_v1 }
 0x1a5   : > { %v408_v3 = vrot.slane %v407_v2, 2 }
 0x1a7   : > { %v409_v4 = vadd.f32 %v408_v3, %v407_v2 }
 0x1a9   : > { %v410_v5 = vrot.slane %v409_v4, 1 }
 0x1ab   : > { %v411_v6 = vadd.f32 %v410_v5, %v409_v4 }
 0x1ad   : > { %752 = vrcp.f32 %v411_v6 }
 0x1b7   : > { %v753_v9 = vpop.eup %752 }
 0x1b8   : > { %v413_v11 = vmul.f32 %v753_v9, %v751_v0 }
 0x1ba   : > { %v414_v12 = vmul.f32 %v413_v11, %v321_v10 }
 0x1bc   : > { %v415_v13 = vrot.slane %v414_v12, 4 }
 0x1be   : > { %v416_v15 = vadd.f32 %v415_v13, %v414_v12 }
 0x1c0   : > { %v417_v16 = vrot.slane %v416_v15, 2 }
 0x1c2   : > { %v418_v18 = vadd.f32 %v417_v16, %v416_v15 }
 0x1c4   : > { %v419_v19 = vrot.slane %v418_v18, 1 }
 0x1c6   : > { %v420_v21 = vadd.f32 %v419_v19, %v418_v18 }
 0x1c8   : > { %v421_v25 = vmul.f32 %v420_v21, %v323_v20 }
 0x1ca   : > { %668 = vmatmul.mubr.f32.vlgmr.msra.gmra.mrb[0].mxu0 %v421_v25 }
 0x29d   : > { %v511_v22 = vpop.f32.mrb[0].mxu0 }
 0x29e   : > { %v512_v27 = vadd.f32 %v597_v23, %v511_v22  ;;  %v669_v26 = vpop.f32.mrb[1].mxu0 }
 0x2a0   : > { %515 = vst.msk [vmem:[%s215_s9] sm:$0xff] %vm250_vm1, %v512_v27 }
 0x2a1   : > { %767 = shalt.err (!%p764_p3)
}
 0x2a2   : > { %s768_s23 = scalar_lea.hbm %s1030_s13, 128  ;;  %s772_s30 = scalar_lea.hbm %s1078_s5, 256 }
 0x2a3   : > { %p769_p4 = scmp.ne.s32.totalorder %s1030_s13, %s768_s23  ;;  %p773_p9 = scmp.lt.u32.totalorder %s1030_s13, %s1078_s5 }
 0x2a4   : > { %p774_p10 = scmp.lt.u32.totalorder %s772_s30, %s768_s23  ;;  %p776_p12 = scmp.lt.u32.totalorder %s768_s23, %s1030_s13 }
 0x2a5   : > { %p770_p7 = pnand %p769_p4, %p890_p5 }
 0x2a6   : > { %p775_p11 = por %p774_p10, %p773_p9 }
 0x2a7   : > { %p771_p8 = pneg %p770_p7 }
 0x2a8   : > { %p777_p13 = por %p776_p12, %p775_p11 }
 0x2aa   : > { %p778_p0 = pnand %p777_p13, %p771_p8 }
 0x2ac   : > { %781 = shalt.err (!%p778_p0)
}
 0x2ad   : > { %708 = dma.vmem_to_hbm [thread:$0]  (%p890_p5), %s1032_s10, 128, %s1030_s13, %s517_s14  }
 0x2ae PF: > { %p714_p1 = scmp.ge.s32.totalorder %s816_s21, 2  ;;  %s542_s8 = sand.u32 1, %s804_s18  }
 0x2af   : > { %s543_s9 = scalar_lea.sflag [#allocation3], %s542_s8 }
 0x2b0   : > { %p711_p2 = pnand %p714_p1, %p894_p6 }
 0x2b2   : > { %799 = dma.done.wait (!%p711_p2), %s543_s9, 128  }
 0x2b3   : > { %801 = vsyncadd (!%p711_p2), %s543_s9, 4294967168  ;;  %p15_p3 = scmp.ge.s32.totalorder %s877_s24, 4   ;;  %s1081_s18 = smov %s808_s19 }
 0x2b4   : > { %s1082_s19 = smov %s812_s20  ;;  %s1083_s20 = smov %s888_s27 }
 0x2b5   : > { %s1084_s21 = smov %s877_s24  ;;  %17 = sbr.rel (!%p15_p3) target bundleno = 3 (0x3), region = 75 }
 0x2bc   :  { %548 = vsyncpa [#allocation3], 1 }
 0x2bd   :  { %550 = vsyncpa [#allocation3 + $0x1], 1 }

</bundles_post_ra>
